<compile_context>
chip_gen: v5e
topology: v5e:2x2
jax: 0.10.0
libtpu: 0.0.40
codegen_flags: <defaults>
</compile_context>

<pallas_src>
import jax
import jax.numpy as jnp
from jax import lax
from jax.experimental import pallas as pl
from jax.experimental.pallas import tpu as pltpu


# ----------------------------------------------------------------------------
# Fused kernel (lane-dense layout: feature dim is W*C)
# ----------------------------------------------------------------------------
def _make_basic_block_kernel(H, WC):
    def _conv3x3(pad_ref, m_ref):
        """3x3 SAME conv on the dense (H, W*C) layout.

        pad_ref : (H+2, WC) f32 VMEM scratch; rows [1:H+1] hold the
                  activation, rows 0 and H+1 are the zero halo.
        m_ref   : (3, WC, WC) per-ky dense row matrices (W shift + channel
                  mixing + BN scale folded host-side).
        returns : (H, WC) f32
        """
        acc = jnp.dot(pad_ref[pl.ds(0, H), :], m_ref[0],
                      preferred_element_type=jnp.float32)
        for ky in (1, 2):
            acc = acc + jnp.dot(pad_ref[pl.ds(ky, H), :], m_ref[ky],
                                preferred_element_type=jnp.float32)
        return acc

    def kernel(x_ref, m1_ref, b1_ref, m2_ref, b2_ref, o_ref,
               xpad_ref, apad_ref):
        # x_ref : (1, H, WC)  lane-dense input (also the residual)
        # m*_ref: (3, WC, WC) folded conv+BN row matrices
        # b*_ref: (1, WC)     folded BN bias (tiled over W)
        # o_ref : (1, H, WC)
        x = x_ref[0].astype(jnp.float32)                    # (H, WC)

        # Zero only the 1-row halos (cheap; safe under core-parallel grids,
        # unlike a one-time zero guarded on pl.program_id).
        zrow = jnp.zeros((1, WC), jnp.float32)
        xpad_ref[pl.ds(0, 1), :] = zrow
        xpad_ref[pl.ds(H + 1, 1), :] = zrow
        apad_ref[pl.ds(0, 1), :] = zrow
        apad_ref[pl.ds(H + 1, 1), :] = zrow

        # ---- conv1 + bn1 + relu (intermediate stays resident in VMEM) ------
        xpad_ref[pl.ds(1, H), :] = x
        a1 = jnp.maximum(_conv3x3(xpad_ref, m1_ref) + b1_ref[...], 0.0)

        # ---- conv2 + bn2 + residual + relu ----------------------------------
        apad_ref[pl.ds(1, H), :] = a1
        y = _conv3x3(apad_ref, m2_ref) + b2_ref[...] + x
        y = jnp.maximum(y, 0.0)
        o_ref[...] = y.reshape(1, H, WC).astype(o_ref.dtype)

    return kernel


# ----------------------------------------------------------------------------
# Host-side folding + wrapper
# ----------------------------------------------------------------------------
def _fold_bn(gamma, beta, mean, var, eps=1e-5):
    scale = gamma / jnp.sqrt(var + eps)
    bias = beta - mean * scale
    return scale, bias


def _dense_row_matrices(w_hwio, scale, W):
    """Fold a 3x3 HWIO conv (+ per-output-channel BN scale) into three dense
    (W*C, W*C) matrices, one per ky:
        M_ky[w_in*C + ci, w_out*C + co] = w[ky, w_in - w_out + 1, ci, co]
    W-boundary zero padding is implicit (no contribution outside the band)."""
    w = (w_hwio * scale).astype(jnp.float32)        # fold BN scale into cout
    mats = []
    for ky in range(3):
        m = jnp.zeros((W * w.shape[2], W * w.shape[3]), jnp.float32)
        for kx in range(3):
            # output column w_out takes input column w_in = w_out + kx - 1
            sel = jnp.eye(W, W, k=1 - kx, dtype=jnp.float32)
            m = m + jnp.kron(sel, w[ky, kx])
        mats.append(m)
    return jnp.stack(mats, axis=0)                  # (3, W*C, W*C)


@jax.jit
def basic_block_forward(x_nchw, params):
    """BasicBlock.forward (stride=1, downsample=None).  NCHW in / NCHW out."""
    N, C, H, W = x_nchw.shape
    WC = W * C

    s1, b1 = _fold_bn(params["bn1_gamma"], params["bn1_beta"],
                      params["bn1_mean"], params["bn1_var"])
    s2, b2 = _fold_bn(params["bn2_gamma"], params["bn2_beta"],
                      params["bn2_mean"], params["bn2_var"])
    m1 = _dense_row_matrices(params["w1"], s1, W)
    m2 = _dense_row_matrices(params["w2"], s2, W)
    b1d = jnp.tile(b1, W).reshape(1, WC).astype(jnp.float32)
    b2d = jnp.tile(b2, W).reshape(1, WC).astype(jnp.float32)

    # NCHW -> NHWC -> lane-dense (N, H, W*C); the final reshape is metadata.
    # TODO(synk): accept/emit NHWC at the module boundary to drop the transpose.
    x = jnp.transpose(x_nchw, (0, 2, 3, 1)).reshape(N, H, WC)

    kernel = _make_basic_block_kernel(H, WC)
    out = pl.pallas_call(
        kernel,
        out_shape=jax.ShapeDtypeStruct((N, H, WC), x_nchw.dtype),
        grid=(N,),
        in_specs=[
            pl.BlockSpec((1, H, WC), lambda n: (n, 0, 0)),   # x / residual
            pl.BlockSpec((3, WC, WC), lambda n: (0, 0, 0)),  # conv1+bn1 mats
            pl.BlockSpec((1, WC), lambda n: (0, 0)),         # bn1 bias
            pl.BlockSpec((3, WC, WC), lambda n: (0, 0, 0)),  # conv2+bn2 mats
            pl.BlockSpec((1, WC), lambda n: (0, 0)),         # bn2 bias
        ],
        out_specs=pl.BlockSpec((1, H, WC), lambda n: (n, 0, 0)),
        scratch_shapes=[
            pltpu.VMEM((H + 2, WC), jnp.float32),   # H-padded input
            pltpu.VMEM((H + 2, WC), jnp.float32),   # H-padded intermediate
        ],
        compiler_params=pltpu.CompilerParams(
            dimension_semantics=("parallel",)),
    )(x, m1, b1d, m2, b2d)

    # lane-dense -> NHWC -> NCHW
    return jnp.transpose(out.reshape(N, H, W, C), (0, 3, 1, 2))


# ----------------------------------------------------------------------------
# Pure-JAX reference (for correctness check)
# ----------------------------------------------------------------------------
def _reference(x_nchw, params):
    x = jnp.transpose(x_nchw, (0, 2, 3, 1))
    dn = ("NHWC", "HWIO", "NHWC")

    s1, b1 = _fold_bn(params["bn1_gamma"], params["bn1_beta"],
                      params["bn1_mean"], params["bn1_var"])
    s2, b2 = _fold_bn(params["bn2_gamma"], params["bn2_beta"],
                      params["bn2_mean"], params["bn2_var"])

    out = lax.conv_general_dilated(x, params["w1"], (1, 1), "SAME",
                                   dimension_numbers=dn)
    out = jnp.maximum(out * s1 + b1, 0.0)
    out = lax.conv_general_dilated(out, params["w2"], (1, 1), "SAME",
                                   dimension_numbers=dn)
    out = jnp.maximum(out * s2 + b2 + x, 0.0)
    return jnp.transpose(out, (0, 3, 1, 2))


# ----------------------------------------------------------------------------
# Main
# ----------------------------------------------------------------------------
if __name__ == "__main__":
    key = jax.random.PRNGKey(0)
    N, C, H, W = 2, 8, 16, 16        # inplanes == planes (downsample=None, stride=1)
    planes = C

    ks = jax.random.split(key, 8)
    x = jax.random.normal(ks[0], (N, C, H, W), jnp.float32)

    # Conv weights in HWIO = (3, 3, Cin, Cout).
    w1 = jax.random.normal(ks[1], (3, 3, C, planes), jnp.float32) * 0.1
    w2 = jax.random.normal(ks[2], (3, 3, planes, planes), jnp.float32) * 0.1

    params = dict(
        w1=w1,
        w2=w2,
        bn1_gamma=1.0 + 0.1 * jax.random.normal(ks[3], (planes,), jnp.float32),
        bn1_beta=0.1 * jax.random.normal(ks[4], (planes,), jnp.float32),
        bn1_mean=0.05 * jax.random.normal(ks[5], (planes,), jnp.float32),
        bn1_var=jnp.abs(1.0 + 0.1 * jax.random.normal(ks[6], (planes,),
                                                      jnp.float32)),
        bn2_gamma=1.0 + 0.1 * jax.random.normal(ks[7], (planes,), jnp.float32),
        bn2_beta=jnp.zeros((planes,), jnp.float32),
        bn2_mean=jnp.zeros((planes,), jnp.float32),
        bn2_var=jnp.ones((planes,), jnp.float32),
    )

    out = basic_block_forward(x, params)
    out = jax.block_until_ready(out)

    ref = _reference(x, params)
    assert out.shape == (N, planes, H, W), out.shape
    max_err = float(jnp.max(jnp.abs(out - ref)))
    assert jnp.allclose(out, ref, atol=1e-4, rtol=1e-4), max_err

    print("KERNEL_OK")
</pallas_src>

<mosaic_0001>
module attributes {stable_mosaic.version = 11 : i64} {
  func.func @kernel(%arg0: i32, %arg1: memref<1x16x128xf32, #tpu.memory_space<vmem>>, %arg2: memref<3x128x128xf32, #tpu.memory_space<vmem>>, %arg3: memref<1x128xf32, #tpu.memory_space<vmem>>, %arg4: memref<3x128x128xf32, #tpu.memory_space<vmem>>, %arg5: memref<1x128xf32, #tpu.memory_space<vmem>>, %arg6: memref<1x16x128xf32, #tpu.memory_space<vmem>>, %arg7: memref<18x128xf32, #tpu.memory_space<vmem>>, %arg8: memref<18x128xf32, #tpu.memory_space<vmem>>) attributes {dimension_semantics = [#tpu.dimension_semantics<parallel>], iteration_bounds = array<i64: 2>, scalar_prefetch = 0 : i64, scratch_operands = 2 : i64, tpu.core_type = #tpu.core_type<tc>, window_params = [{transform_indices = @transform_0, window_bounds = array<i64: 1, 16, 128>}, {pipeline_mode = #tpu.pipeline_mode<synchronous>, transform_indices = @transform_1, window_bounds = array<i64: 3, 128, 128>}, {pipeline_mode = #tpu.pipeline_mode<synchronous>, transform_indices = @transform_2, window_bounds = array<i64: 1, 128>}, {pipeline_mode = #tpu.pipeline_mode<synchronous>, transform_indices = @transform_3, window_bounds = array<i64: 3, 128, 128>}, {pipeline_mode = #tpu.pipeline_mode<synchronous>, transform_indices = @transform_4, window_bounds = array<i64: 1, 128>}, {transform_indices = @transform_5, window_bounds = array<i64: 1, 16, 128>}]} {
    %c0 = arith.constant 0 : index
    %c0_0 = arith.constant 0 : index
    %c0_1 = arith.constant 0 : index
    %0 = vector.load %arg1[%c0, %c0_0, %c0_1] : memref<1x16x128xf32, #tpu.memory_space<vmem>>, vector<1x16x128xf32>
    %1 = vector.shape_cast %0 : vector<1x16x128xf32> to vector<16x128xf32>
    %cst = arith.constant 0.000000e+00 : f32
    %2 = vector.broadcast %cst : f32 to vector<1x128xf32>
    %c0_2 = arith.constant 0 : index
    %c0_3 = arith.constant 0 : index
    %3 = vector.load %arg7[%c0_2, %c0_3] : memref<18x128xf32, #tpu.memory_space<vmem>>, vector<1x128xf32>
    tpu.vector_store %arg7[%c0_2, %c0_3], %2 {strides = array<i32>} : memref<18x128xf32, #tpu.memory_space<vmem>>, vector<1x128xf32>,
    %c17 = arith.constant 17 : index
    %c0_4 = arith.constant 0 : index
    %4 = vector.load %arg7[%c17, %c0_4] : memref<18x128xf32, #tpu.memory_space<vmem>>, vector<1x128xf32>
    tpu.vector_store %arg7[%c17, %c0_4], %2 {strides = array<i32>} : memref<18x128xf32, #tpu.memory_space<vmem>>, vector<1x128xf32>,
    %c0_5 = arith.constant 0 : index
    %c0_6 = arith.constant 0 : index
    %5 = vector.load %arg8[%c0_5, %c0_6] : memref<18x128xf32, #tpu.memory_space<vmem>>, vector<1x128xf32>
    tpu.vector_store %arg8[%c0_5, %c0_6], %2 {strides = array<i32>} : memref<18x128xf32, #tpu.memory_space<vmem>>, vector<1x128xf32>,
    %c17_7 = arith.constant 17 : index
    %c0_8 = arith.constant 0 : index
    %6 = vector.load %arg8[%c17_7, %c0_8] : memref<18x128xf32, #tpu.memory_space<vmem>>, vector<1x128xf32>
    tpu.vector_store %arg8[%c17_7, %c0_8], %2 {strides = array<i32>} : memref<18x128xf32, #tpu.memory_space<vmem>>, vector<1x128xf32>,
    %c1 = arith.constant 1 : index
    %c0_9 = arith.constant 0 : index
    %7 = vector.load %arg7[%c1, %c0_9] : memref<18x128xf32, #tpu.memory_space<vmem>>, vector<16x128xf32>
    tpu.vector_store %arg7[%c1, %c0_9], %1 {strides = array<i32>} : memref<18x128xf32, #tpu.memory_space<vmem>>, vector<16x128xf32>,
    %c0_10 = arith.constant 0 : index
    %c0_11 = arith.constant 0 : index
    %8 = vector.load %arg7[%c0_10, %c0_11] : memref<18x128xf32, #tpu.memory_space<vmem>>, vector<16x128xf32>
    %c0_12 = arith.constant 0 : index
    %c0_13 = arith.constant 0 : index
    %c0_14 = arith.constant 0 : index
    %9 = vector.load %arg2[%c0_12, %c0_13, %c0_14] : memref<3x128x128xf32, #tpu.memory_space<vmem>>, vector<1x128x128xf32>
    %10 = vector.shape_cast %9 : vector<1x128x128xf32> to vector<128x128xf32>
    %cst_15 = arith.constant dense<0.000000e+00> : vector<16x128xf32>
    %11 = tpu.matmul %8, %10, %cst_15 {dimension_numbers = #tpu.dot_dimension_numbers<[1], [0], [0], [1], [0, 0, 1, 1], [], []>} : vector<16x128xf32>, vector<128x128xf32>, vector<16x128xf32> -> vector<16x128xf32>
    %c1_16 = arith.constant 1 : index
    %c0_17 = arith.constant 0 : index
    %12 = vector.load %arg7[%c1_16, %c0_17] : memref<18x128xf32, #tpu.memory_space<vmem>>, vector<16x128xf32>
    %c1_18 = arith.constant 1 : index
    %c0_19 = arith.constant 0 : index
    %c0_20 = arith.constant 0 : index
    %13 = vector.load %arg2[%c1_18, %c0_19, %c0_20] : memref<3x128x128xf32, #tpu.memory_space<vmem>>, vector<1x128x128xf32>
    %14 = vector.shape_cast %13 : vector<1x128x128xf32> to vector<128x128xf32>
    %cst_21 = arith.constant dense<0.000000e+00> : vector<16x128xf32>
    %15 = tpu.matmul %12, %14, %cst_21 {dimension_numbers = #tpu.dot_dimension_numbers<[1], [0], [0], [1], [0, 0, 1, 1], [], []>} : vector<16x128xf32>, vector<128x128xf32>, vector<16x128xf32> -> vector<16x128xf32>
    %16 = arith.addf %11, %15 : vector<16x128xf32>
    %c2 = arith.constant 2 : index
    %c0_22 = arith.constant 0 : index
    %17 = vector.load %arg7[%c2, %c0_22] : memref<18x128xf32, #tpu.memory_space<vmem>>, vector<16x128xf32>
    %c2_23 = arith.constant 2 : index
    %c0_24 = arith.constant 0 : index
    %c0_25 = arith.constant 0 : index
    %18 = vector.load %arg2[%c2_23, %c0_24, %c0_25] : memref<3x128x128xf32, #tpu.memory_space<vmem>>, vector<1x128x128xf32>
    %19 = vector.shape_cast %18 : vector<1x128x128xf32> to vector<128x128xf32>
    %cst_26 = arith.constant dense<0.000000e+00> : vector<16x128xf32>
    %20 = tpu.matmul %17, %19, %cst_26 {dimension_numbers = #tpu.dot_dimension_numbers<[1], [0], [0], [1], [0, 0, 1, 1], [], []>} : vector<16x128xf32>, vector<128x128xf32>, vector<16x128xf32> -> vector<16x128xf32>
    %21 = arith.addf %16, %20 : vector<16x128xf32>
    %c0_27 = arith.constant 0 : index
    %c0_28 = arith.constant 0 : index
    %22 = vector.load %arg3[%c0_27, %c0_28] : memref<1x128xf32, #tpu.memory_space<vmem>>, vector<1x128xf32>
    %23 = vector.broadcast %22 : vector<1x128xf32> to vector<16x128xf32>
    %24 = arith.addf %21, %23 : vector<16x128xf32>
    %cst_29 = arith.constant 0.000000e+00 : f32
    %25 = vector.broadcast %cst_29 : f32 to vector<16x128xf32>
    %26 = arith.maximumf %24, %25 : vector<16x128xf32>
    %c1_30 = arith.constant 1 : index
    %c0_31 = arith.constant 0 : index
    %27 = vector.load %arg8[%c1_30, %c0_31] : memref<18x128xf32, #tpu.memory_space<vmem>>, vector<16x128xf32>
    tpu.vector_store %arg8[%c1_30, %c0_31], %26 {strides = array<i32>} : memref<18x128xf32, #tpu.memory_space<vmem>>, vector<16x128xf32>,
    %c0_32 = arith.constant 0 : index
    %c0_33 = arith.constant 0 : index
    %28 = vector.load %arg8[%c0_32, %c0_33] : memref<18x128xf32, #tpu.memory_space<vmem>>, vector<16x128xf32>
    %c0_34 = arith.constant 0 : index
    %c0_35 = arith.constant 0 : index
    %c0_36 = arith.constant 0 : index
    %29 = vector.load %arg4[%c0_34, %c0_35, %c0_36] : memref<3x128x128xf32, #tpu.memory_space<vmem>>, vector<1x128x128xf32>
    %30 = vector.shape_cast %29 : vector<1x128x128xf32> to vector<128x128xf32>
    %cst_37 = arith.constant dense<0.000000e+00> : vector<16x128xf32>
    %31 = tpu.matmul %28, %30, %cst_37 {dimension_numbers = #tpu.dot_dimension_numbers<[1], [0], [0], [1], [0, 0, 1, 1], [], []>} : vector<16x128xf32>, vector<128x128xf32>, vector<16x128xf32> -> vector<16x128xf32>
    %c1_38 = arith.constant 1 : index
    %c0_39 = arith.constant 0 : index
    %32 = vector.load %arg8[%c1_38, %c0_39] : memref<18x128xf32, #tpu.memory_space<vmem>>, vector<16x128xf32>
    %c1_40 = arith.constant 1 : index
    %c0_41 = arith.constant 0 : index
    %c0_42 = arith.constant 0 : index
    %33 = vector.load %arg4[%c1_40, %c0_41, %c0_42] : memref<3x128x128xf32, #tpu.memory_space<vmem>>, vector<1x128x128xf32>
    %34 = vector.shape_cast %33 : vector<1x128x128xf32> to vector<128x128xf32>
    %cst_43 = arith.constant dense<0.000000e+00> : vector<16x128xf32>
    %35 = tpu.matmul %32, %34, %cst_43 {dimension_numbers = #tpu.dot_dimension_numbers<[1], [0], [0], [1], [0, 0, 1, 1], [], []>} : vector<16x128xf32>, vector<128x128xf32>, vector<16x128xf32> -> vector<16x128xf32>
    %36 = arith.addf %31, %35 : vector<16x128xf32>
    %c2_44 = arith.constant 2 : index
    %c0_45 = arith.constant 0 : index
    %37 = vector.load %arg8[%c2_44, %c0_45] : memref<18x128xf32, #tpu.memory_space<vmem>>, vector<16x128xf32>
    %c2_46 = arith.constant 2 : index
    %c0_47 = arith.constant 0 : index
    %c0_48 = arith.constant 0 : index
    %38 = vector.load %arg4[%c2_46, %c0_47, %c0_48] : memref<3x128x128xf32, #tpu.memory_space<vmem>>, vector<1x128x128xf32>
    %39 = vector.shape_cast %38 : vector<1x128x128xf32> to vector<128x128xf32>
    %cst_49 = arith.constant dense<0.000000e+00> : vector<16x128xf32>
    %40 = tpu.matmul %37, %39, %cst_49 {dimension_numbers = #tpu.dot_dimension_numbers<[1], [0], [0], [1], [0, 0, 1, 1], [], []>} : vector<16x128xf32>, vector<128x128xf32>, vector<16x128xf32> -> vector<16x128xf32>
    %41 = arith.addf %36, %40 : vector<16x128xf32>
    %c0_50 = arith.constant 0 : index
    %c0_51 = arith.constant 0 : index
    %42 = vector.load %arg5[%c0_50, %c0_51] : memref<1x128xf32, #tpu.memory_space<vmem>>, vector<1x128xf32>
    %43 = vector.broadcast %42 : vector<1x128xf32> to vector<16x128xf32>
    %44 = arith.addf %41, %43 : vector<16x128xf32>
    %45 = arith.addf %44, %1 : vector<16x128xf32>
    %cst_52 = arith.constant 0.000000e+00 : f32
    %46 = vector.broadcast %cst_52 : f32 to vector<16x128xf32>
    %47 = arith.maximumf %45, %46 : vector<16x128xf32>
    %48 = vector.shape_cast %47 : vector<16x128xf32> to vector<1x16x128xf32>
    %c0_53 = arith.constant 0 : index
    %c0_54 = arith.constant 0 : index
    %c0_55 = arith.constant 0 : index
    %49 = vector.load %arg6[%c0_53, %c0_54, %c0_55] : memref<1x16x128xf32, #tpu.memory_space<vmem>>, vector<1x16x128xf32>
    tpu.vector_store %arg6[%c0_53, %c0_54, %c0_55], %48 {strides = array<i32>} : memref<1x16x128xf32, #tpu.memory_space<vmem>>, vector<1x16x128xf32>,
    return
  }
  func.func @transform_0(%arg0: i32) -> (i32, i32, i32) {
    %c0_i32 = arith.constant 0 : i32
    %c0_i32_0 = arith.constant 0 : i32
    %c0_i32_1 = arith.constant 0 : i32
    return %arg0, %c0_i32, %c0_i32_0 : i32, i32, i32
  }
  func.func @transform_1(%arg0: i32) -> (i32, i32, i32) {
    %c0_i32 = arith.constant 0 : i32
    %c0_i32_0 = arith.constant 0 : i32
    %c0_i32_1 = arith.constant 0 : i32
    %c0_i32_2 = arith.constant 0 : i32
    return %c0_i32, %c0_i32_0, %c0_i32_1 : i32, i32, i32
  }
  func.func @transform_2(%arg0: i32) -> (i32, i32) {
    %c0_i32 = arith.constant 0 : i32
    %c0_i32_0 = arith.constant 0 : i32
    %c0_i32_1 = arith.constant 0 : i32
    return %c0_i32, %c0_i32_0 : i32, i32
  }
  func.func @transform_3(%arg0: i32) -> (i32, i32, i32) {
    %c0_i32 = arith.constant 0 : i32
    %c0_i32_0 = arith.constant 0 : i32
    %c0_i32_1 = arith.constant 0 : i32
    %c0_i32_2 = arith.constant 0 : i32
    return %c0_i32, %c0_i32_0, %c0_i32_1 : i32, i32, i32
  }
  func.func @transform_4(%arg0: i32) -> (i32, i32) {
    %c0_i32 = arith.constant 0 : i32
    %c0_i32_0 = arith.constant 0 : i32
    %c0_i32_1 = arith.constant 0 : i32
    return %c0_i32, %c0_i32_0 : i32, i32
  }
  func.func @transform_5(%arg0: i32) -> (i32, i32, i32) {
    %c0_i32 = arith.constant 0 : i32
    %c0_i32_0 = arith.constant 0 : i32
    %c0_i32_1 = arith.constant 0 : i32
    return %arg0, %c0_i32, %c0_i32_0 : i32, i32, i32
  }
}

</mosaic_0001>

<bundles_post_ra>
// kernel: tile.13
= control target key start
LH: loop header
LB: loop body
LE: loop exit
PB: predicated region body
PF: predicated region fallthrough
CT: control target
= control target key end

     0   :  { %s28_s0 = inlined_call_operand.vmem [shape: f32[8], index: 0, kind: input, shape index: {}]   ;;  %s29_s1 = inlined_call_operand.vmem [shape: f32[16,8], index: 1, kind: output, shape index: {}]  }
   0x1   :  { %v4_v0 = vld [vmem:[%s28_s0] ss:$0 sm:$0xff] }
   0x2   :  { %5 = vst [vmem:[%s29_s1] sm:$0xff] %v4_v0 }
   0x3   :  { %8 = vst [vmem:[%s29_s1 + $0x8] sm:$0xff] %v4_v0 }

// kernel: tile.14
= control target key start
LH: loop header
LB: loop body
LE: loop exit
PB: predicated region body
PF: predicated region fallthrough
CT: control target
= control target key end

     0   :  { %s131_s10 = smov 120   ;;  %s132_s11 = smov 104   ;;  %vm3_vm0 = vcmask 64512   ;;  %vm9_vm1 = vcmask 1048512   ;;  %vm15_vm2 = vcmask 982912   ;;  %vm21_vm3 = vcmask 917312   ;;  %s207_s0 = inlined_call_operand.vmem [shape: f32[16,8], index: 0, kind: input, shape index: {}]   ;;  %s208_s1 = inlined_call_operand.vmem [shape: f32[1,128], index: 1, kind: output, shape index: {}]  }
   0x1   :  { %v101_v0 = vld [vmem:[%s207_s0 + $0xf] sm:$0x1]   ;;  %v103_v1 = vld [vmem:[%s207_s0 + $0xd] sm:$0x1]   ;;  %v105_v2 = vld [vmem:[%s207_s0 + $0xb] sm:$0x1]  }
   0x2   :  { %7 = vrot.lane.b32.xlu0 %v101_v0, %s131_s10  ;;  %19 = vrot.lane.b32.xlu1 %v103_v1, %s132_s11  ;;  %s133_s14 = smov 88   ;;  %v102_v3 = vld [vmem:[%s207_s0 + $0xe] sm:$0x1]   ;;  %v104_v4 = vld [vmem:[%s207_s0 + $0xc] sm:$0x1]   ;;  %s134_s19 = smov 112  }
   0x3   :  { %31 = vrot.lane.b32.xlu2 %v105_v2, %s133_s14  ;;  %s135_s20 = smov 96   ;;  %v106_v5 = vld [vmem:[%s207_s0 + $0xa] sm:$0x1]   ;;  %s136_s23 = smov 80   ;;  %v107_v6 = vld [vmem:[%s207_s0 + $0x9] sm:$0x1]  }
   0x4   :  { %v108_v7 = vld [vmem:[%s207_s0 + $0x8] sm:$0x1]   ;;  %s137_s28 = smov 72   ;;  %s138_s29 = smov 64   ;;  %v109_v8 = vld [vmem:[%s207_s0 + $0x7] sm:$0x1]  }
   0x5   :  { %s139_s3 = smov 56   ;;  %v110_v9 = vld [vmem:[%s207_s0 + $0x6] sm:$0x1]   ;;  %v111_v10 = vld [vmem:[%s207_s0 + $0x5] sm:$0x1]   ;;  %s140_s8 = smov 48  }
   0x6   :  { %s141_s9 = smov 40   ;;  %v112_v11 = vld [vmem:[%s207_s0 + $0x4] sm:$0x1]   ;;  %s142_s12 = smov 32   ;;  %v113_v12 = vld [vmem:[%s207_s0 + $0x3] sm:$0x1]  }
   0x7   :  { %v114_v13 = vld [vmem:[%s207_s0 + $0x2] sm:$0x1]   ;;  %s143_s17 = smov 24   ;;  %s144_s18 = smov 16   ;;  %v115_v14 = vld [vmem:[%s207_s0 + $0x1] sm:$0x1]  }
   0x8   :  { %s145_s21 = smov 8   ;;  %v2_v15 = vld [vmem:[%s207_s0] sm:$0x1]   ;;  %vm27_vm4 = vcmask 851712   ;;  %vm33_vm5 = vcmask 786112   ;;  %vm39_vm6 = vcmask 720512  }
   0x9   :  { %4 = vst.msk [vmem:[#allocation0] sm:$0x1] %vm3_vm0, %v2_v15   ;;  %vm45_vm7 = vcmask 654912   ;;  %vm51_vm8 = vcmask 589312   ;;  %vm57_vm9 = vcmask 523712   ;;  %vm63_vm10 = vcmask 458112  }
   0xa   :  { %13 = vrot.lane.b32.xlu0 %v102_v3, %s134_s19  ;;  %25 = vrot.lane.b32.xlu1 %v104_v4, %s135_s20  ;;  %vm69_vm11 = vcmask 392512   ;;  %vm75_vm12 = vcmask 326912   ;;  %vm81_vm13 = vcmask 261312   ;;  %vm87_vm14 = vcmask 195712  }
   0xb   :  { %37 = vrot.lane.b32.xlu2 %v106_v5, %s136_s23  ;;  %vm93_vm15 = vcmask 130112  }
  0x12   :  { %43 = vrot.lane.b32.xlu0 %v107_v6, %s137_s28  ;;  %49 = vrot.lane.b32.xlu1 %v108_v7, %s138_s29 }
  0x13   :  { %55 = vrot.lane.b32.xlu2 %v109_v8, %s139_s3 }
  0x1a   :  { %61 = vrot.lane.b32.xlu0 %v110_v9, %s140_s8  ;;  %67 = vrot.lane.b32.xlu1 %v111_v10, %s141_s9 }
  0x1b   :  { %73 = vrot.lane.b32.xlu2 %v112_v11, %s142_s12 }
  0x22   :  { %79 = vrot.lane.b32.xlu0 %v113_v12, %s143_s17  ;;  %85 = vrot.lane.b32.xlu1 %v114_v13, %s144_s18 }
  0x23   :  { %91 = vrot.lane.b32.xlu2 %v115_v14, %s145_s21 }
  0x5d   :  { %v32_v16 = vpop.permute.xlu2 %31  }
  0x65   :  { %v38_v17 = vpop.permute.xlu2 %37  }
  0x6d   :  { %v56_v18 = vpop.permute.xlu2 %55  }
  0x74   :  { %v8_v19 = vpop.permute.xlu0 %7   ;;  %v20_v20 = vpop.permute.xlu1 %19  }
  0x75   :  { %10 = vst.msk [vmem:[#allocation0] sm:$0x1] %vm9_vm1, %v8_v19   ;;  %v74_v21 = vpop.permute.xlu2 %73  }
  0x7c   :  { %v14_v22 = vpop.permute.xlu0 %13   ;;  %v26_v23 = vpop.permute.xlu1 %25  }
  0x7d   :  { %16 = vst.msk [vmem:[#allocation0] sm:$0x1] %vm15_vm2, %v14_v22   ;;  %v92_v24 = vpop.permute.xlu2 %91  }
  0x7e   :  { %22 = vst.msk [vmem:[#allocation0] sm:$0x1] %vm21_vm3, %v20_v20  }
  0x7f   :  { %28 = vst.msk [vmem:[#allocation0] sm:$0x1] %vm27_vm4, %v26_v23  }
  0x80   :  { %34 = vst.msk [vmem:[#allocation0] sm:$0x1] %vm33_vm5, %v32_v16  }
  0x81   :  { %40 = vst.msk [vmem:[#allocation0] sm:$0x1] %vm39_vm6, %v38_v17  }
  0x84   :  { %v44_v25 = vpop.permute.xlu0 %43   ;;  %v50_v26 = vpop.permute.xlu1 %49  }
  0x85   :  { %46 = vst.msk [vmem:[#allocation0] sm:$0x1] %vm45_vm7, %v44_v25  }
  0x86   :  { %52 = vst.msk [vmem:[#allocation0] sm:$0x1] %vm51_vm8, %v50_v26  }
  0x87   :  { %58 = vst.msk [vmem:[#allocation0] sm:$0x1] %vm57_vm9, %v56_v18  }
  0x8c   :  { %v62_v27 = vpop.permute.xlu0 %61   ;;  %v68_v28 = vpop.permute.xlu1 %67  }
  0x8d   :  { %64 = vst.msk [vmem:[#allocation0] sm:$0x1] %vm63_vm10, %v62_v27  }
  0x8e   :  { %70 = vst.msk [vmem:[#allocation0] sm:$0x1] %vm69_vm11, %v68_v28  }
  0x8f   :  { %76 = vst.msk [vmem:[#allocation0] sm:$0x1] %vm75_vm12, %v74_v21  }
  0x94   :  { %v80_v29 = vpop.permute.xlu0 %79   ;;  %v86_v30 = vpop.permute.xlu1 %85  }
  0x95   :  { %82 = vst.msk [vmem:[#allocation0] sm:$0x1] %vm81_vm13, %v80_v29  }
  0x96   :  { %88 = vst.msk [vmem:[#allocation0] sm:$0x1] %vm87_vm14, %v86_v30  }
  0x97   :  { %94 = vst.msk [vmem:[#allocation0] sm:$0x1] %vm93_vm15, %v92_v24  }
  0x9e   :  { %v97_v31 = vld [vmem:[#allocation0] sm:$0x1] }
  0x9f   :  { %100 = vst [vmem:[%s208_s1] sm:$0x1] %v97_v31 }

// kernel: basic_block_forward.1
= control target key start
LH: loop header
LB: loop body
LE: loop exit
PB: predicated region body
PF: predicated region fallthrough
CT: control target
= control target key end

     0   :  { %s723_s18 = smov 0   ;;  %s1057_s0 = inlined_call_operand.vmem [shape: f32[2,16,128], index: 0, kind: input, shape index: {}]   ;;  %s1058_s1 = inlined_call_operand.vmem [shape: f32[3,128,128], index: 1, kind: input, shape index: {}]   ;;  %s1059_s2 = inlined_call_operand.vmem [shape: f32[1,128], index: 2, kind: input, shape index: {}]   ;;  %s1060_s3 = inlined_call_operand.vmem [shape: f32[3,128,128], index: 3, kind: input, shape index: {}]   ;;  %s1061_s4 = inlined_call_operand.vmem [shape: f32[1,128], index: 4, kind: input, shape index: {}]   ;;  %s1062_s5 = inlined_call_operand.vmem [shape: f32[2,16,128], index: 5, kind: output, shape index: {}]  }
   0x1 LB: > { %s564_s19 = sadd.s32 4294967295, %s690_s18   ;;  %p568_p0 = scmp.ge.s32.totalorder %s690_s18, 1  ;;  %s690_s18 = sphi %s723_s18, %s15_s18  }
   0x2   : > { %p187_p1 = scmp.lt.s32.totalorder %s690_s18, 3 }
   0x4   : > { %p188_p2 = pnand %p568_p0, %p187_p1 }
   0x5   : > { %p740_p3 = scmp.lt.s32.totalorder (!%p188_p2), %s564_s19, 1 }
   0x6   : > { %191 = sbr.rel (%p188_p2) target bundleno = 340 (0x154), region = 40 }
   0xb   : > { %v604_v0 = vld [vmem:[%s1058_s1 + $0x178] sm:$0xff]  ;;  %v603_v1 = vld [vmem:[%s1058_s1 + $0x170] sm:$0xff]  ;;  %v692_v5 = vmov 0.0   ;;  %v602_v6 = vld [vmem:[%s1058_s1 + $0x168] sm:$0xff]  ;;  %s1065_s19 = smov (!%p740_p3, %s564_s19), 1 }
   0xc   : > { %v588_v2 = vld [vmem:[%s1058_s1 + $0xf8] sm:$0xff]  ;;  %335 = vmatpush.msra.mxu2 %v604_v0  ;;  %v587_v4 = vld [vmem:[%s1058_s1 + $0xf0] sm:$0xff]  ;;  %227 = vst [vmem:[#allocation2] sm:$0x1] %v692_v5  ;;  %v586_v8 = vld [vmem:[%s1058_s1 + $0xe8] sm:$0xff]  ;;  %s639_s7 = sshll.u32 %s1065_s19, 4 }
   0xd   : > { %270 = vmatpush.msra.mxu0 %v588_v2  ;;  %v250_v3 = vld [vmem:[%s1058_s1 + $0x78] sm:$0xff]  ;;  %v249_v7 = vld [vmem:[%s1058_s1 + $0x70] sm:$0xff]  ;;  %228 = vst [vmem:[#allocation2 + $0x11] sm:$0x1] %v692_v5  ;;  %v248_v9 = vld [vmem:[%s1058_s1 + $0x68] sm:$0xff]  ;;  %s219_s20 = scalar_lea.vmem %s1057_s0, %s639_s7  ;;  %s224_s23 = scalar_lea.vmem %s1062_s5, %s639_s7 }
   0xe   : > { %293 = vmatpush.msra.mxu1 %v250_v3  ;;  %336 = vmatpush.msra.mxu2 %v603_v1  ;;  %229 = vst [vmem:[#allocation3] sm:$0x1] %v692_v5  ;;  %v601_v10 = vld [vmem:[%s1058_s1 + $0x160] sm:$0xff]  ;;  %v600_v13 = vld [vmem:[%s1058_s1 + $0x158] sm:$0xff]  ;;  %v599_v16 = vld [vmem:[%s1058_s1 + $0x150] sm:$0xff] }
   0xf   : > { %271 = vmatpush.msra.mxu0 %v587_v4  ;;  %v585_v11 = vld [vmem:[%s1058_s1 + $0xe0] sm:$0xff]  ;;  %230 = vst [vmem:[#allocation3 + $0x11] sm:$0x1] %v692_v5  ;;  %v584_v14 = vld [vmem:[%s1058_s1 + $0xd8] sm:$0xff]  ;;  %v583_v17 = vld [vmem:[%s1058_s1 + $0xd0] sm:$0xff] }
  0x10   : > { %294 = vmatpush.msra.mxu1 %v249_v7  ;;  %337 = vmatpush.msra.mxu2 %v602_v6  ;;  %v247_v12 = vld [vmem:[%s1058_s1 + $0x60] sm:$0xff]  ;;  %v246_v15 = vld [vmem:[%s1058_s1 + $0x58] sm:$0xff]  ;;  %v245_v18 = vld [vmem:[%s1058_s1 + $0x50] sm:$0xff] }
  0x11   : > { %272 = vmatpush.msra.mxu0 %v586_v8  ;;  %v598_v19 = vld [vmem:[%s1058_s1 + $0x148] sm:$0xff]  ;;  %v597_v22 = vld [vmem:[%s1058_s1 + $0x140] sm:$0xff]  ;;  %v596_v25 = vld [vmem:[%s1058_s1 + $0x138] sm:$0xff] }
  0x12   : > { %295 = vmatpush.msra.mxu1 %v248_v9  ;;  %338 = vmatpush.msra.mxu2 %v601_v10  ;;  %v582_v20 = vld [vmem:[%s1058_s1 + $0xc8] sm:$0xff]  ;;  %v581_v23 = vld [vmem:[%s1058_s1 + $0xc0] sm:$0xff]  ;;  %v580_v26 = vld [vmem:[%s1058_s1 + $0xb8] sm:$0xff] }
  0x13   : > { %273 = vmatpush.msra.mxu0 %v585_v11  ;;  %v244_v21 = vld [vmem:[%s1058_s1 + $0x48] sm:$0xff]  ;;  %v243_v24 = vld [vmem:[%s1058_s1 + $0x40] sm:$0xff]  ;;  %v242_v28 = vld [vmem:[%s1058_s1 + $0x38] sm:$0xff] }
  0x14   : > { %296 = vmatpush.msra.mxu1 %v247_v12  ;;  %339 = vmatpush.msra.mxu2 %v600_v13  ;;  %v823_v27 = vld [vmem:[%s219_s20] sm:$0xff]  ;;  %v828_v29 = vld [vmem:[%s219_s20 + $0x8] sm:$0xff]  ;;  %v595_v30 = vld [vmem:[%s1058_s1 + $0x130] sm:$0xff] }
  0x15   : > { %274 = vmatpush.msra.mxu0 %v584_v14  ;;  %231 = vst [vmem:[#allocation2 + $0x1] sm:$0xff] %v823_v27  ;;  %v579_v31 = vld [vmem:[%s1058_s1 + $0xb0] sm:$0xff]  ;;  %v620_v32 = vld [vmem:[%s1060_s3 + $0xf8] sm:$0xff]  ;;  %v594_v35 = vld [vmem:[%s1058_s1 + $0x128] sm:$0xff] }
  0x16   : > { %297 = vmatpush.msra.mxu1 %v246_v15  ;;  %340 = vmatpush.msra.mxu2 %v599_v16  ;;  %232 = vst [vmem:[#allocation2 + $0x9] sm:$0xff] %v828_v29  ;;  %v241_v33 = vld [vmem:[%s1058_s1 + $0x30] sm:$0xff]  ;;  %v578_v36 = vld [vmem:[%s1058_s1 + $0xa8] sm:$0xff]  ;;  %v593_v39 = vld [vmem:[%s1058_s1 + $0x120] sm:$0xff] }
  0x17   : > { %275 = vmatpush.msra.mxu0 %v583_v17  ;;  %v619_v34 = vld [vmem:[%s1060_s3 + $0xf0] sm:$0xff]  ;;  %407 = vmatpush.msra.mxu3 %v620_v32  ;;  %v240_v37 = vld [vmem:[%s1058_s1 + $0x28] sm:$0xff]  ;;  %v577_v40 = vld [vmem:[%s1058_s1 + $0xa0] sm:$0xff] }
  0x18   : > { %298 = vmatpush.msra.mxu1 %v245_v18  ;;  %341 = vmatpush.msra.mxu2 %v598_v19  ;;  %v618_v38 = vld [vmem:[%s1060_s3 + $0xe8] sm:$0xff]  ;;  %v239_v41 = vld [vmem:[%s1058_s1 + $0x20] sm:$0xff]  ;;  %v592_v43 = vld [vmem:[%s1058_s1 + $0x118] sm:$0xff] }
  0x19   : > { %276 = vmatpush.msra.mxu0 %v582_v20  ;;  %408 = vmatpush.msra.mxu3 %v619_v34  ;;  %v617_v42 = vld [vmem:[%s1060_s3 + $0xe0] sm:$0xff]  ;;  %v576_v44 = vld [vmem:[%s1058_s1 + $0x98] sm:$0xff]  ;;  %v591_v47 = vld [vmem:[%s1058_s1 + $0x110] sm:$0xff] }
  0x1a   : > { %299 = vmatpush.msra.mxu1 %v244_v21  ;;  %342 = vmatpush.msra.mxu2 %v597_v22  ;;  %v238_v45 = vld [vmem:[%s1058_s1 + $0x18] sm:$0xff]  ;;  %v575_v48 = vld [vmem:[%s1058_s1 + $0x90] sm:$0xff]  ;;  %v590_v49 = vld [vmem:[%s1058_s1 + $0x108] sm:$0xff] }
  0x1b   : > { %277 = vmatpush.msra.mxu0 %v581_v23  ;;  %409 = vmatpush.msra.mxu3 %v618_v38  ;;  %v616_v46 = vld [vmem:[%s1060_s3 + $0xd8] sm:$0xff]  ;;  %v237_v50 = vld [vmem:[%s1058_s1 + $0x10] sm:$0xff]  ;;  %v574_v52 = vld [vmem:[%s1058_s1 + $0x88] sm:$0xff] }
  0x1c   : > { %300 = vmatpush.msra.mxu1 %v243_v24  ;;  %343 = vmatpush.msra.mxu2 %v596_v25  ;;  %v615_v51 = vld [vmem:[%s1060_s3 + $0xd0] sm:$0xff]  ;;  %v236_v53 = vld [vmem:[%s1058_s1 + $0x8] sm:$0xff]  ;;  %v589_v55 = vld [vmem:[%s1058_s1 + $0x100] sm:$0xff] }
  0x1d   : > { %278 = vmatpush.msra.mxu0 %v580_v26  ;;  %410 = vmatpush.msra.mxu3 %v617_v42  ;;  %v614_v54 = vld [vmem:[%s1060_s3 + $0xc8] sm:$0xff]  ;;  %v573_v56 = vld [vmem:[%s1058_s1 + $0x80] sm:$0xff]  ;;  %v387_v61 = vld [vmem:[%s1060_s3 + $0x78] sm:$0xff] }
  0x1e   : > { %301 = vmatpush.msra.mxu1 %v242_v28  ;;  %344 = vmatpush.msra.mxu2 %v595_v30  ;;  %v316_v57 = vld [vmem:[#allocation2 + $0x2] sm:$0xff]  ;;  %v636_v62 = vld [vmem:[%s1060_s3 + $0x178] sm:$0xff]  ;;  %v386_v0 = vld [vmem:[%s1060_s3 + $0x70] sm:$0xff] }
  0x1f   : > { %279 = vmatpush.msra.mxu0 %v579_v31  ;;  %411 = vmatpush.msra.mxu3 %v616_v46  ;;  %v235_v58 = vld [vmem:[%s1058_s1] sm:$0xff]  ;;  %v612_v63 = vld [vmem:[%s1060_s3 + $0xb8] sm:$0xff]  ;;  %v635_v1 = vld [vmem:[%s1060_s3 + $0x170] sm:$0xff] }
  0x20   : > { %302 = vmatpush.msra.mxu1 %v241_v33  ;;  %345 = vmatpush.msra.mxu2 %v594_v35  ;;  %v233_v59 = vld [vmem:[#allocation2] sm:$0xff]  ;;  %v611_v2 = vld [vmem:[%s1060_s3 + $0xb0] sm:$0xff]  ;;  %v385_v3 = vld [vmem:[%s1060_s3 + $0x68] sm:$0xff] }
  0x21   : > { %280 = vmatpush.msra.mxu0 %v578_v36  ;;  %412 = vmatpush.msra.mxu3 %v615_v51  ;;  %v613_v60 = vld [vmem:[%s1060_s3 + $0xc0] sm:$0xff]  ;;  %v634_v4 = vld [vmem:[%s1060_s3 + $0x168] sm:$0xff]  ;;  %v383_v10 = vld [vmem:[%s1060_s3 + $0x58] sm:$0xff] }
  0x22   : > { %303 = vmatpush.msra.mxu1 %v240_v37  ;;  %346 = vmatpush.msra.mxu2 %v593_v39  ;;  %v317_v5 = vld [vmem:[#allocation2 + $0xa] sm:$0xff]  ;;  %v384_v8 = vld [vmem:[%s1060_s3 + $0x60] sm:$0xff]  ;;  %v608_v11 = vld [vmem:[%s1060_s3 + $0x98] sm:$0xff] }
  0x23   : > { %281 = vmatpush.msra.mxu0 %v577_v40  ;;  %413 = vmatpush.msra.mxu3 %v614_v54  ;;  %v610_v6 = vld [vmem:[%s1060_s3 + $0xa8] sm:$0xff]  ;;  %v609_v9 = vld [vmem:[%s1060_s3 + $0xa0] sm:$0xff]  ;;  %v382_v12 = vld [vmem:[%s1060_s3 + $0x50] sm:$0xff] }
  0x24   : > { %304 = vmatpush.msra.mxu1 %v239_v41  ;;  %347 = vmatpush.msra.mxu2 %v592_v43  ;;  %v234_v7 = vld [vmem:[#allocation2 + $0x8] sm:$0xff]  ;;  %v607_v13 = vld [vmem:[%s1060_s3 + $0x90] sm:$0xff]  ;;  %v605_v16 = vld [vmem:[%s1060_s3 + $0x80] sm:$0xff] }
  0x25   : > { %282 = vmatpush.msra.mxu0 %v576_v44  ;;  %414 = vmatpush.msra.mxu3 %v613_v60  ;;  %v381_v14 = vld [vmem:[%s1060_s3 + $0x48] sm:$0xff]  ;;  %v380_v17 = vld [vmem:[%s1060_s3 + $0x40] sm:$0xff]  ;;  %v379_v19 = vld [vmem:[%s1060_s3 + $0x38] sm:$0xff] }
  0x26   : > { %305 = vmatpush.msra.mxu1 %v238_v45  ;;  %348 = vmatpush.msra.mxu2 %v591_v47  ;;  %v606_v15 = vld [vmem:[%s1060_s3 + $0x88] sm:$0xff]  ;;  %v633_v18 = vld [vmem:[%s1060_s3 + $0x160] sm:$0xff]  ;;  %v632_v20 = vld [vmem:[%s1060_s3 + $0x158] sm:$0xff] }
  0x27   : > { %283 = vmatpush.msra.mxu0 %v575_v48  ;;  %415 = vmatpush.msra.mxu3 %v612_v63  ;;  %v378_v21 = vld [vmem:[%s1060_s3 + $0x30] sm:$0xff]  ;;  %v377_v23 = vld [vmem:[%s1060_s3 + $0x28] sm:$0xff]  ;;  %v376_v25 = vld [vmem:[%s1060_s3 + $0x20] sm:$0xff] }
  0x28   : > { %306 = vmatpush.msra.mxu1 %v237_v50  ;;  %349 = vmatpush.msra.mxu2 %v590_v49  ;;  %v631_v22 = vld [vmem:[%s1060_s3 + $0x150] sm:$0xff]  ;;  %v630_v24 = vld [vmem:[%s1060_s3 + $0x148] sm:$0xff]  ;;  %v629_v26 = vld [vmem:[%s1060_s3 + $0x140] sm:$0xff] }
  0x29   : > { %284 = vmatpush.msra.mxu0 %v574_v52  ;;  %416 = vmatpush.msra.mxu3 %v611_v2  ;;  %v375_v28 = vld [vmem:[%s1060_s3 + $0x18] sm:$0xff]  ;;  %v374_v31 = vld [vmem:[%s1060_s3 + $0x10] sm:$0xff]  ;;  %v373_v33 = vld [vmem:[%s1060_s3 + $0x8] sm:$0xff] }
  0x2a   : > { %307 = vmatpush.msra.mxu1 %v236_v53  ;;  %350 = vmatpush.msra.mxu2 %v589_v55  ;;  %v628_v30 = vld [vmem:[%s1060_s3 + $0x138] sm:$0xff]  ;;  %v627_v32 = vld [vmem:[%s1060_s3 + $0x130] sm:$0xff]  ;;  %v626_v34 = vld [vmem:[%s1060_s3 + $0x128] sm:$0xff] }
  0x2b   : > { %285 = vmatpush.msra.mxu0 %v573_v56  ;;  %351 = vmatmul.f32.vlgmr.msra.gmra.mxu2 %v316_v57  ;;  %v372_v35 = vld [vmem:[%s1060_s3] sm:$0xff]  ;;  %v624_v37 = vld [vmem:[%s1060_s3 + $0x118] sm:$0xff]  ;;  %v623_v38 = vld [vmem:[%s1060_s3 + $0x110] sm:$0xff] }
  0x2c   : > { %308 = vmatpush.msra.mxu1 %v235_v58  ;;  %286 = vmatmul.f32.vlgmr.msra.gmra.mxu0 %v823_v27  ;;  %v625_v36 = vld [vmem:[%s1060_s3 + $0x120] sm:$0xff]  ;;  %v622_v39 = vld [vmem:[%s1060_s3 + $0x108] sm:$0xff] }
  0x2d   : > { %309 = vmatmul.f32.vlgmr.msra.gmra.mxu1 %v233_v59  ;;  %430 = vmatpush.msrb.mxu0 %v387_v61  ;;  %v621_v40 = vld [vmem:[%s1060_s3 + $0x100] sm:$0xff] }
  0x2e   : > { %641 = vmatpush.msrb.mxu2 %v387_v61  ;;  %472 = vmatpush.msrb.mxu1 %v636_v62  ;;  %v682_v44 = vld [vmem:[%s1059_s2] ss:$0 sm:$0xff] }
  0x2f   : > { %431 = vmatpush.msrb.mxu0 %v386_v0  ;;  %417 = vmatpush.msra.mxu3 %v610_v6 }
  0x30   : > { %642 = vmatpush.msrb.mxu2 %v386_v0  ;;  %473 = vmatpush.msrb.mxu1 %v635_v1  ;;  %v683_v0 = vld [vmem:[%s1061_s4] ss:$0 sm:$0xff] }
  0x31   : > { %432 = vmatpush.msrb.mxu0 %v385_v3  ;;  %418 = vmatpush.msra.mxu3 %v609_v9 }
  0x32   : > { %643 = vmatpush.msrb.mxu2 %v385_v3  ;;  %474 = vmatpush.msrb.mxu1 %v634_v4 }
  0x33   : > { %354 = vmatmul.f32.gmra.mxu2 %v317_v5  ;;  %433 = vmatpush.msrb.mxu0 %v384_v8 }
  0x34   : > { %289 = vmatmul.f32.gmra.mxu0 %v828_v29  ;;  %644 = vmatpush.msrb.mxu2 %v384_v8 }
  0x35   : > { %312 = vmatmul.f32.gmra.mxu1 %v234_v7  ;;  %434 = vmatpush.msrb.mxu0 %v383_v10 }
  0x36   : > { %419 = vmatpush.msra.mxu3 %v608_v11  ;;  %645 = vmatpush.msrb.mxu2 %v383_v10 }
  0x37   : > { %435 = vmatpush.msrb.mxu0 %v382_v12  ;;  %475 = vmatpush.msrb.mxu1 %v633_v18 }
  0x38   : > { %420 = vmatpush.msra.mxu3 %v607_v13  ;;  %646 = vmatpush.msrb.mxu2 %v382_v12 }
  0x39   : > { %436 = vmatpush.msrb.mxu0 %v381_v14  ;;  %476 = vmatpush.msrb.mxu1 %v632_v20 }
  0x3a   : > { %421 = vmatpush.msra.mxu3 %v606_v15  ;;  %647 = vmatpush.msrb.mxu2 %v381_v14 }
  0x3b   : > { %437 = vmatpush.msrb.mxu0 %v380_v17  ;;  %477 = vmatpush.msrb.mxu1 %v631_v22 }
  0x3c   : > { %422 = vmatpush.msra.mxu3 %v605_v16  ;;  %648 = vmatpush.msrb.mxu2 %v380_v17 }
  0x3d   : > { %438 = vmatpush.msrb.mxu0 %v379_v19  ;;  %478 = vmatpush.msrb.mxu1 %v630_v24 }
  0x3e   : > { %657 = vmatpush.msrb.mxu3 %v636_v62  ;;  %649 = vmatpush.msrb.mxu2 %v379_v19 }
  0x3f   : > { %439 = vmatpush.msrb.mxu0 %v378_v21  ;;  %479 = vmatpush.msrb.mxu1 %v629_v26 }
  0x40   : > { %658 = vmatpush.msrb.mxu3 %v635_v1  ;;  %650 = vmatpush.msrb.mxu2 %v378_v21 }
  0x41   : > { %440 = vmatpush.msrb.mxu0 %v377_v23  ;;  %480 = vmatpush.msrb.mxu1 %v628_v30 }
  0x42   : > { %659 = vmatpush.msrb.mxu3 %v634_v4  ;;  %651 = vmatpush.msrb.mxu2 %v377_v23 }
  0x43   : > { %441 = vmatpush.msrb.mxu0 %v376_v25  ;;  %481 = vmatpush.msrb.mxu1 %v627_v32 }
  0x44   : > { %660 = vmatpush.msrb.mxu3 %v633_v18  ;;  %652 = vmatpush.msrb.mxu2 %v376_v25 }
  0x45   : > { %442 = vmatpush.msrb.mxu0 %v375_v28  ;;  %482 = vmatpush.msrb.mxu1 %v626_v34 }
  0x46   : > { %661 = vmatpush.msrb.mxu3 %v632_v20  ;;  %653 = vmatpush.msrb.mxu2 %v375_v28 }
  0x47   : > { %443 = vmatpush.msrb.mxu0 %v374_v31  ;;  %483 = vmatpush.msrb.mxu1 %v625_v36 }
  0x48   : > { %662 = vmatpush.msrb.mxu3 %v631_v22  ;;  %654 = vmatpush.msrb.mxu2 %v374_v31 }
  0x49   : > { %444 = vmatpush.msrb.mxu0 %v373_v33  ;;  %484 = vmatpush.msrb.mxu1 %v624_v37 }
  0x4a   : > { %663 = vmatpush.msrb.mxu3 %v630_v24  ;;  %655 = vmatpush.msrb.mxu2 %v373_v33 }
  0x4b   : > { %445 = vmatpush.msrb.mxu0 %v372_v35  ;;  %485 = vmatpush.msrb.mxu1 %v623_v38 }
  0x4c   : > { %664 = vmatpush.msrb.mxu3 %v629_v26  ;;  %656 = vmatpush.msrb.mxu2 %v372_v35 }
  0x4d   : > { %486 = vmatpush.msrb.mxu1 %v622_v39 }
  0x4e   : > { %665 = vmatpush.msrb.mxu3 %v628_v30 }
  0x4f   : > { %487 = vmatpush.msrb.mxu1 %v621_v40 }
  0x50   : > { %666 = vmatpush.msrb.mxu3 %v627_v32 }
  0x52   : > { %667 = vmatpush.msrb.mxu3 %v626_v34 }
  0x54   : > { %668 = vmatpush.msrb.mxu3 %v625_v36 }
  0x56   : > { %669 = vmatpush.msrb.mxu3 %v624_v37 }
  0x58   : > { %670 = vmatpush.msrb.mxu3 %v623_v38 }
  0x5a   : > { %671 = vmatpush.msrb.mxu3 %v622_v39 }
  0x5c   : > { %672 = vmatpush.msrb.mxu3 %v621_v40 }
  0xa9   : > { %v287_v41 = vpop.f32.mrf.mxu0 }
  0xaa   : > { %v310_v42 = vpop.f32.mrf.mxu1 }
  0xab   : > { %v311_v43 = vadd.f32 %v310_v42, %v287_v41 }
  0xae   : > { %v352_v45 = vpop.f32.mrf.mxu2 }
  0xaf   : > { %v358_v46 = vadd.f32 %v352_v45, %v311_v43 }
  0xb1   : > { %v364_v47 = vadd.f32 %v682_v44, %v358_v46  ;;  %v290_v48 = vpop.f32.mrf.mxu0 }
  0xb2   : > { %v313_v49 = vpop.f32.mrf.mxu1 }
  0xb3   : > { %v366_v50 = vmax.f32 %v364_v47, 0.0  ;;  %v314_v51 = vadd.f32 %v313_v49, %v290_v48 }
  0xb5   : > { %368 = vst [vmem:[#allocation3 + $0x1] sm:$0xff] %v366_v50  ;;  %423 = vmatmul.f32.vlgmr.msra.gmra.mxu3 %v366_v50 }
  0xb6   : > { %v355_v52 = vpop.f32.mrf.mxu2 }
  0xb7   : > { %v359_v53 = vadd.f32 %v355_v52, %v314_v51 }
  0xb9   : > { %v365_v54 = vadd.f32 %v682_v44, %v359_v53 }
  0xbb   : > { %v367_v55 = vmax.f32 %v365_v54, 0.0 }
  0xbc   : > { %v370_v56 = vld [vmem:[#allocation3] sm:$0xff] }
  0xbd   : > { %369 = vst [vmem:[#allocation3 + $0x9] sm:$0xff] %v367_v55  ;;  %446 = vmatmul.f32.vlgmr.msrb.gmra.mxu0 %v370_v56  ;;  %426 = vmatmul.f32.gmra.mxu3 %v367_v55 }
  0xc4   : > { %v371_v57 = vld [vmem:[#allocation3 + $0x8] sm:$0xff] }
  0xc5   : > { %v453_v58 = vld [vmem:[#allocation3 + $0x2] sm:$0xff]  ;;  %v454_v59 = vld [vmem:[#allocation3 + $0xa] sm:$0xff]  ;;  %449 = vmatmul.f32.vlgmr.msrb.gmra.mxu2 %v371_v57 }
  0xc6   : > { %488 = vmatmul.f32.vlgmr.msrb.gmra.mxu1 %v453_v58  ;;  %491 = vmatmul.f32.vlgmr.msrb.gmra.mxu3 %v454_v59 }
 0x138   : > { %v424_v60 = vpop.f32.mrf.mxu3 }
 0x13a   : > { %v447_v61 = vpop.f32.mrf.mxu0 }
 0x13b   : > { %v448_v63 = vadd.f32 %v447_v61, %v424_v60 }
 0x140   : > { %v427_v62 = vpop.f32.mrf.mxu3 }
 0x143   : > { %v489_v1 = vpop.f32.mrf.mxu1 }
 0x144   : > { %v495_v2 = vadd.f32 %v489_v1, %v448_v63 }
 0x146   : > { %v501_v3 = vadd.f32 %v683_v0, %v495_v2 }
 0x148   : > { %v503_v4 = vadd.f32 %v501_v3, %v823_v27  ;;  %v450_v5 = vpop.f32.mrf.mxu2 }
 0x149   : > { %v451_v7 = vadd.f32 %v450_v5, %v427_v62  ;;  %v492_v8 = vpop.f32.mrf.mxu3 }
 0x14a   : > { %v505_v6 = vmax.f32 %v503_v4, 0.0 }
 0x14b   : > { %v496_v9 = vadd.f32 %v492_v8, %v451_v7 }
 0x14c   : > { %507 = vst [vmem:[%s224_s23] sm:$0xff] %v505_v6 }
 0x14d   : > { %v502_v10 = vadd.f32 %v683_v0, %v496_v9 }
 0x14f   : > { %v504_v11 = vadd.f32 %v502_v10, %v828_v29 }
 0x151   : > { %v506_v12 = vmax.f32 %v504_v11, 0.0 }
 0x153   : > { %508 = vst [vmem:[%s224_s23 + $0x8] sm:$0xff] %v506_v12 }
 0x154 PF: > { %s15_s18 = sadd.s32 1, %s690_s18  }
 0x155   : > { %p12_p4 = scmp.ge.s32.totalorder %s15_s18, 4  }
 0x157   :  { %14 = sbr.rel (!%p12_p4) target bundleno = 1 (0x1), region = 74 }

</bundles_post_ra>
